<compile_context>
chip_gen: v7x
topology: tpu7x:2x2x1
jax: 0.10.0
libtpu: 0.0.40
codegen_flags: <defaults>
</compile_context>

<pallas_src>
import functools

import jax
import jax.numpy as jnp
from jax.experimental import pallas as pl
from jax.experimental.pallas import tpu as pltpu

_LANE = 128


def _round_up(v, m):
    return ((v + m - 1) // m) * m


def _linear_kernel(x_ref, w_ref, b_ref, o_ref):
    # x_ref: (TB, K)  w_ref: (K, N_pad)  b_ref: (1, N_pad)  o_ref: (TB, N_pad)
    acc = jnp.dot(x_ref[...], w_ref[...], preferred_element_type=jnp.float32)
    o_ref[...] = (acc + b_ref[...]).astype(o_ref.dtype)


def prepare_params(weight, bias):
    """One-time prep, outside the hot path.

    weight: (n_classes, n_attr), bias: (n_classes,)   [nn.Linear layout]
    Returns:
      w_pad: (n_attr, N_pad)  -- transposed once, zero-padded class lanes
      b_pad: (1, N_pad)       -- zero-padded class lanes
    where N_pad = n_classes rounded up to a multiple of 128.
    """
    n_classes, n_attr = weight.shape
    n_pad = _round_up(n_classes, _LANE)
    w_pad = jnp.zeros((n_attr, n_pad), weight.dtype).at[:, :n_classes].set(weight.T)
    b_pad = jnp.zeros((1, n_pad), bias.dtype).at[0, :n_classes].set(bias)
    return w_pad, b_pad


@functools.partial(jax.jit, static_argnames=("n_classes", "block_b"))
def cub_logistic_oracle_forward(x, w_pad, b_pad, *, n_classes, block_b=512):
    """x: (B, n_attr); w_pad: (n_attr, N_pad); b_pad: (1, N_pad)."""
    B, n_attr = x.shape
    K, n_pad = w_pad.shape
    assert K == n_attr

    # Batch tile: full batch if small (legal full-extent block), else 512 rows
    # (multiple of 8 sublanes; partial edge blocks are handled by Pallas).
    tb = B if B <= block_b else block_b
    grid = (pl.cdiv(B, tb),)

    cost = pl.CostEstimate(
        flops=2 * B * n_attr * n_pad,
        transcendentals=0,
        bytes_accessed=4 * (x.size + w_pad.size + b_pad.size + B * n_pad),
    )

    out_padded = pl.pallas_call(
        _linear_kernel,
        out_shape=jax.ShapeDtypeStruct((B, n_pad), x.dtype),
        grid_spec=pl.GridSpec(
            grid=grid,
            in_specs=[
                pl.BlockSpec((tb, n_attr), lambda i: (i, 0)),   # x: tiled over batch
                pl.BlockSpec((K, n_pad), lambda i: (0, 0)),     # W: VMEM-resident
                pl.BlockSpec((1, n_pad), lambda i: (0, 0)),     # bias: VMEM-resident
            ],
            out_specs=pl.BlockSpec((tb, n_pad), lambda i: (i, 0)),
        ),
        compiler_params=pltpu.CompilerParams(
            dimension_semantics=("parallel",)),
        cost_estimate=cost,
    )(x, w_pad, b_pad)

    # Drop the zero-padded class lanes (cheap slice outside the kernel).
    return out_padded[:, :n_classes]


if __name__ == "__main__":
    # Small shapes consistent with the module (actual CUB: n_attr=112, n_classes=200).
    B, n_attr, n_classes = 8, 112, 200

    key = jax.random.PRNGKey(0)
    kx, kw, kb = jax.random.split(key, 3)

    x = jax.random.normal(kx, (B, n_attr), dtype=jnp.float32)
    # Deterministic "nn.Linear"-style init (uniform in +-1/sqrt(n_attr)).
    bound = 1.0 / (n_attr ** 0.5)
    weight = jax.random.uniform(kw, (n_classes, n_attr), jnp.float32, -bound, bound)
    bias = jax.random.uniform(kb, (n_classes,), jnp.float32, -bound, bound)

    # One-time parameter prep (not part of the per-call hot path).
    w_pad, b_pad = prepare_params(weight, bias)

    out = cub_logistic_oracle_forward(x, w_pad, b_pad, n_classes=n_classes)
    jax.block_until_ready(out)

    # Sanity check against plain JAX reference.
    ref = x @ weight.T + bias
    assert out.shape == (B, n_classes)
    assert jnp.allclose(out, ref, atol=1e-5, rtol=1e-5)

    print("KERNEL_OK")
</pallas_src>

<mosaic_0001>
module attributes {stable_mosaic.version = 11 : i64} {
  func.func @_linear_kernel(%arg0: i32, %arg1: memref<8x112xf32, #tpu.memory_space<vmem>>, %arg2: memref<112x256xf32, #tpu.memory_space<vmem>>, %arg3: memref<1x256xf32, #tpu.memory_space<vmem>>, %arg4: memref<8x256xf32, #tpu.memory_space<vmem>>) attributes {dimension_semantics = [#tpu.dimension_semantics<parallel>], iteration_bounds = array<i64: 1>, scalar_prefetch = 0 : i64, scratch_operands = 0 : i64, tpu.core_type = #tpu.core_type<tc>, window_params = [{transform_indices = @transform_0, window_bounds = array<i64: 8, 112>}, {pipeline_mode = #tpu.pipeline_mode<synchronous>, transform_indices = @transform_1, window_bounds = array<i64: 112, 256>}, {pipeline_mode = #tpu.pipeline_mode<synchronous>, transform_indices = @transform_2, window_bounds = array<i64: 1, 256>}, {transform_indices = @transform_3, window_bounds = array<i64: 8, 256>}]} {
    %c0 = arith.constant 0 : index
    %c0_0 = arith.constant 0 : index
    %0 = vector.load %arg1[%c0, %c0_0] : memref<8x112xf32, #tpu.memory_space<vmem>>, vector<8x112xf32>
    %c0_1 = arith.constant 0 : index
    %c0_2 = arith.constant 0 : index
    %1 = vector.load %arg2[%c0_1, %c0_2] : memref<112x256xf32, #tpu.memory_space<vmem>>, vector<112x256xf32>
    %cst = arith.constant dense<0.000000e+00> : vector<8x256xf32>
    %2 = tpu.matmul %0, %1, %cst {dimension_numbers = #tpu.dot_dimension_numbers<[1], [0], [0], [1], [0, 0, 1, 1], [], []>} : vector<8x112xf32>, vector<112x256xf32>, vector<8x256xf32> -> vector<8x256xf32>
    %c0_3 = arith.constant 0 : index
    %c0_4 = arith.constant 0 : index
    %3 = vector.load %arg3[%c0_3, %c0_4] : memref<1x256xf32, #tpu.memory_space<vmem>>, vector<1x256xf32>
    %4 = vector.broadcast %3 : vector<1x256xf32> to vector<8x256xf32>
    %5 = arith.addf %2, %4 : vector<8x256xf32>
    %c0_5 = arith.constant 0 : index
    %c0_6 = arith.constant 0 : index
    %6 = vector.load %arg4[%c0_5, %c0_6] : memref<8x256xf32, #tpu.memory_space<vmem>>, vector<8x256xf32>
    tpu.vector_store %arg4[%c0_5, %c0_6], %5 {strides = array<i32>} : memref<8x256xf32, #tpu.memory_space<vmem>>, vector<8x256xf32>,
    return
  }
  func.func @transform_0(%arg0: i32) -> (i32, i32) {
    %c0_i32 = arith.constant 0 : i32
    %c0_i32_0 = arith.constant 0 : i32
    return %arg0, %c0_i32 : i32, i32
  }
  func.func @transform_1(%arg0: i32) -> (i32, i32) {
    %c0_i32 = arith.constant 0 : i32
    %c0_i32_0 = arith.constant 0 : i32
    %c0_i32_1 = arith.constant 0 : i32
    return %c0_i32, %c0_i32_0 : i32, i32
  }
  func.func @transform_2(%arg0: i32) -> (i32, i32) {
    %c0_i32 = arith.constant 0 : i32
    %c0_i32_0 = arith.constant 0 : i32
    %c0_i32_1 = arith.constant 0 : i32
    return %c0_i32, %c0_i32_0 : i32, i32
  }
  func.func @transform_3(%arg0: i32) -> (i32, i32) {
    %c0_i32 = arith.constant 0 : i32
    %c0_i32_0 = arith.constant 0 : i32
    return %arg0, %c0_i32 : i32, i32
  }
}

</mosaic_0001>

<bundles_post_ra>
// kernel: cub_logistic_oracle_forward.1
= control target key start
LH: loop header
LB: loop body
LE: loop exit
PB: predicated region body
PF: predicated region fallthrough
CT: control target
= control target key end

     0   :  { %8 = vsyncpa [#allocation3], 0  ;;  %s354_s0 = inlined_call_operand.hbm [shape: f32[8,112], index: 0, kind: input, shape index: {}]   ;;  %s355_s1 = inlined_call_operand.hbm [shape: f32[112,256], index: 1, kind: input, shape index: {}]   ;;  %s356_s2 = inlined_call_operand.vmem [shape: f32[1,256], index: 2, kind: input, shape index: {}]   ;;  %s357_s3 = inlined_call_operand.hbm [shape: f32[8,256], index: 3, kind: output, shape index: {}]  }
   0x1   :  { %9 = vsyncpa [#allocation6], 0 }
   0x2   :  { %10 = vsyncpa [#allocation4], 0  ;;  %s282_s12 = smov [#allocation2]   ;;  %s283_s14 = smov [#allocation5]  }
   0x3   :  { %s17_s13 = sshll.u32 %s282_s12, 4  ;;  %s26_s15 = sshll.u32 %s283_s14, 4  ;;  %s18_s13 = int_to_ptr.vmem [resolvable:$true] %s17_s13  ;;  %s308_s15 = int_to_ptr.vmem [resolvable:$true] %s26_s15 }
   0x4   :  { %s210_s18 = scalar_lea.hbm %s354_s0, 128 }
   0x5   :  { %p211_p0 = scmp.ne.s32.totalorder %s354_s0, %s210_s18  ;;  %p214_p1 = scmp.lt.u32.totalorder %s210_s18, %s354_s0 }
   0x7   :  { %p216_p2 = pnand %p214_p1, %p211_p0 }
   0x9   :  { %219 = shalt.err (!%p216_p2)
}
   0xa   :  { %s220_s23 = scalar_lea.vmem %s18_s13, 128  ;;  %p225_p4 = scmp.lt.s32.totalorder %s18_s13, %s18_s13 }
   0xb   :  { %p221_p3 = scmp.ne.s32.totalorder %s18_s13, %s220_s23  ;;  %p226_p5 = scmp.lt.s32.totalorder %s220_s23, %s220_s23 }
   0xd   :  { %p227_p6 = por %p226_p5, %p225_p4 }
   0xf   :  { %p228_p7 = pnand %p227_p6, %p221_p3 }
  0x11   :  { %231 = shalt.err (!%p228_p7)
}
  0x12   :  { %20 = dma.hbm_to_vmem [thread:$0]  %s354_s0, 128, %s18_s13, [#allocation3]  }
  0x13   :  { %s232_s28 = scalar_lea.hbm %s355_s1, 3584 }
  0x14   :  { %p233_p8 = scmp.ne.s32.totalorder %s355_s1, %s232_s28  ;;  %p236_p9 = scmp.lt.u32.totalorder %s232_s28, %s355_s1 }
  0x16   :  { %p238_p10 = pnand %p236_p9, %p233_p8 }
  0x18   :  { %241 = shalt.err (!%p238_p10)
}
  0x19   :  { %s242_s6 = scalar_lea.vmem %s308_s15, 3584  ;;  %p247_p12 = scmp.lt.s32.totalorder %s308_s15, %s308_s15 }
  0x1a   :  { %p243_p11 = scmp.ne.s32.totalorder %s308_s15, %s242_s6  ;;  %p248_p13 = scmp.lt.s32.totalorder %s242_s6, %s242_s6 }
  0x1c   :  { %p249_p0 = por %p248_p13, %p247_p12 }
  0x1e   :  { %p250_p1 = pnand %p249_p0, %p243_p11 }
  0x20   :  { %253 = shalt.err (!%p250_p1)
}
  0x21   :  { %s284_s0 = smov 256   ;;  %s285_s7 = smov 16  }
  0x22   :  { %32 = dma.hbm_to_vmem [thread:$0]  %s355_s1, 3584, %s308_s15, [#allocation6], %s284_s0, %s284_s0, %s285_s7  }
  0x23   :  { %276 = dma.done.wait [#allocation3], 128  }
  0x24   :  { %277 = vsyncadd [#allocation3], 4294967168 }
  0x25   :  { %278 = dma.done.wait [#allocation6], 3584  }
  0x26   :  { %279 = vsyncadd [#allocation6], 4294963712  ;;  %v286_v0 = vmov 0.0   ;;  %v43_v1 = vld [vmem:[#allocation5 + $0x8] sm:$0xff]  ;;  %v45_v2 = vld [vmem:[#allocation5 + $0x18] sm:$0xff]  ;;  %vm82_vm0 = vcmask 916480   ;;  %v72_v44 = vlaneseq }
  0x27   :  { %150 = vmatprep.mubr.f32.mxu0 %v286_v0  ;;  %v42_v3 = vld [vmem:[#allocation5] sm:$0xff]  ;;  %v176_v4 = vpack.c.bf16 %v45_v2, %v43_v1  ;;  %v44_v5 = vld [vmem:[#allocation5 + $0x10] sm:$0xff]  ;;  %v47_v6 = vld [vmem:[#allocation5 + $0x28] sm:$0xff]  ;;  %s287_s11 = smov [#allocation7]  }
  0x28   :  { %v49_v7 = vld [vmem:[#allocation5 + $0x38] sm:$0xff]  ;;  %v178_v8 = vpack.c.bf16 %v44_v5, %v42_v3  ;;  %v46_v10 = vld [vmem:[#allocation5 + $0x20] sm:$0xff]  ;;  %v48_v11 = vld [vmem:[#allocation5 + $0x30] sm:$0xff]  ;;  %v73_v45 = vshrl.u32 %v72_v44, 7  ;;  %s165_s12 = sshll.u32 %s287_s11, 4  ;;  %s166_s12 = int_to_ptr.vmem [resolvable:$true] %s165_s12 }
  0x29   :  { %v180_v9 = vpack.c.bf16 %v49_v7, %v47_v6  ;;  %v51_v12 = vld [vmem:[#allocation5 + $0x48] sm:$0xff]  ;;  %177 = vmatprep.subr.bf16.mxu0 %v176_v4  ;;  %v53_v13 = vld [vmem:[#allocation5 + $0x58] sm:$0xff]  ;;  %v182_v14 = vpack.c.bf16 %v48_v11, %v46_v10  ;;  %v50_v16 = vld [vmem:[#allocation5 + $0x40] sm:$0xff]  ;;  %s254_s13 = scalar_lea.vmem %s166_s12, 256  ;;  %p259_p3 = scmp.lt.s32.totalorder %s166_s12, %s166_s12 }
  0x2a   :  { %179 = vmatpush1.bf16.msra.mxu0 %v178_v8  ;;  %v184_v15 = vpack.c.bf16 %v53_v13, %v51_v12  ;;  %v52_v17 = vld [vmem:[#allocation5 + $0x50] sm:$0xff]  ;;  %v55_v18 = vld [vmem:[#allocation5 + $0x68] sm:$0xff]  ;;  %v57_v19 = vld [vmem:[#allocation5 + $0x78] sm:$0xff]  ;;  %v74_v46 = vsub.s32 0, %v73_v45  ;;  %v78_v48 = vsub.s32 1, %v73_v45  ;;  %p255_p2 = scmp.ne.s32.totalorder %s166_s12, %s254_s13  ;;  %p260_p4 = scmp.lt.s32.totalorder %s254_s13, %s254_s13 }
  0x2b   :  { %181 = vmatprep.subr.bf16.mxu0 %v180_v9  ;;  %v186_v20 = vpack.c.bf16 %v52_v17, %v50_v16  ;;  %v188_v21 = vpack.c.bf16 %v57_v19, %v55_v18  ;;  %v54_v22 = vld [vmem:[#allocation5 + $0x60] sm:$0xff]  ;;  %v56_v23 = vld [vmem:[#allocation5 + $0x70] sm:$0xff]  ;;  %v59_v24 = vld [vmem:[#allocation5 + $0x88] sm:$0xff] }
  0x2c   :  { %v61_v25 = vld [vmem:[#allocation5 + $0x98] sm:$0xff]  ;;  %v190_v26 = vpack.c.bf16 %v56_v23, %v54_v22  ;;  %v58_v28 = vld [vmem:[#allocation5 + $0x80] sm:$0xff]  ;;  %v60_v29 = vld [vmem:[#allocation5 + $0x90] sm:$0xff]  ;;  %p261_p5 = por %p260_p4, %p259_p3 }
  0x2d   :  { %v192_v27 = vpack.c.bf16 %v61_v25, %v59_v24  ;;  %v63_v30 = vld [vmem:[#allocation5 + $0xa8] sm:$0xff]  ;;  %v65_v31 = vld [vmem:[#allocation5 + $0xb8] sm:$0xff]  ;;  %v194_v32 = vpack.c.bf16 %v60_v29, %v58_v28  ;;  %v62_v34 = vld [vmem:[#allocation5 + $0xa0] sm:$0xff] }
  0x2e   :  { %183 = vmatpush1.bf16.msra.mxu0 %v182_v14  ;;  %v196_v33 = vpack.c.bf16 %v65_v31, %v63_v30  ;;  %v64_v35 = vld [vmem:[#allocation5 + $0xb0] sm:$0xff]  ;;  %v67_v36 = vld [vmem:[#allocation5 + $0xc8] sm:$0xff]  ;;  %v69_v37 = vld [vmem:[#allocation5 + $0xd8] sm:$0xff]  ;;  %p262_p6 = pnand %p261_p5, %p255_p2 }
  0x2f   :  { %185 = vmatprep.subr.bf16.mxu0 %v184_v15  ;;  %v198_v38 = vpack.c.bf16 %v64_v35, %v62_v34  ;;  %v200_v39 = vpack.c.bf16 %v69_v37, %v67_v36  ;;  %v66_v40 = vld [vmem:[#allocation5 + $0xc0] sm:$0xff]  ;;  %v68_v41 = vld [vmem:[#allocation5 + $0xd0] sm:$0xff]  ;;  %v41_v43 = vld [vmem:[#allocation2] sm:$0xff] }
  0x30   :  { %v202_v42 = vpack.c.bf16 %v68_v41, %v66_v40  ;;  %v70_v47 = vld [vmem:[%s356_s2] sm:$0x3] }
  0x31   :  { %v75_v49 = vrot.slane %v70_v47, %v74_v46  ;;  %v79_v50 = vrot.slane %v70_v47, %v78_v48 }
  0x32   :  { %187 = vmatpush1.bf16.msra.mxu0 %v186_v20 }
  0x33   :  { %189 = vmatprep.subr.bf16.mxu0 %v188_v21 }
  0x36   :  { %191 = vmatpush1.bf16.msra.mxu0 %v190_v26 }
  0x37   :  { %193 = vmatprep.subr.bf16.mxu0 %v192_v27 }
  0x3a   :  { %195 = vmatpush1.bf16.msra.mxu0 %v194_v32 }
  0x3b   :  { %197 = vmatprep.subr.bf16.mxu0 %v196_v33 }
  0x3e   :  { %199 = vmatpush1.bf16.msra.mxu0 %v198_v38 }
  0x3f   :  { %201 = vmatprep.subr.bf16.mxu0 %v200_v39 }
  0x42   :  { %203 = vmatpush1.bf16.msra.mxu0 %v202_v42 }
  0x45   :  { %175 = vmatmul.mubr.msk.f32.vlgmr.msra.gmra.mrb[0].mxu0 %vm82_vm0, %v41_v43 }
 0x118   :  { %v152_v51 = vpop.f32.mrb[0].mxu0 }
 0x119   :  { %v153_v52 = vadd.f32 %v152_v51, %v75_v49  ;;  %v154_v53 = vpop.f32.mrb[1].mxu0 }
 0x11a   :  { %v155_v54 = vadd.f32 %v154_v53, %v79_v50 }
 0x11b   :  { %157 = vst [vmem:[#allocation7] sm:$0xff] %v153_v52 }
 0x11c   :  { %158 = vst [vmem:[#allocation7 + $0x8] sm:$0xff] %v155_v54 }
 0x11d   :  { %265 = shalt.err (!%p262_p6)
}
 0x11e   :  { %s266_s15 = scalar_lea.hbm %s357_s3, 256 }
 0x11f   :  { %p267_p7 = scmp.ne.s32.totalorder %s357_s3, %s266_s15  ;;  %p270_p8 = scmp.lt.u32.totalorder %s266_s15, %s357_s3 }
 0x121   :  { %p272_p9 = pnand %p270_p8, %p267_p7 }
 0x123   :  { %275 = shalt.err (!%p272_p9)
}
 0x124   :  { %168 = dma.vmem_to_hbm [thread:$0]  %s166_s12, 256, %s357_s3, [#allocation4]  }
 0x125   :  { %280 = dma.done.wait [#allocation4], 256  }
 0x126   :  { %281 = vsyncadd [#allocation4], 4294967040 }
 0x127   :  { %172 = vsyncpa [#allocation3], 1 }
 0x128   :  { %173 = vsyncpa [#allocation6], 1 }
 0x129   :  { %174 = vsyncpa [#allocation4], 1 }

</bundles_post_ra>
